<compile_context>
chip_gen: v7x
topology: tpu7x:2x2x1
jax: 0.10.0
libtpu: 0.0.40
codegen_flags: <defaults>
</compile_context>

<pallas_src>
import jax
import jax.numpy as jnp
import numpy as np
from jax.experimental import pallas as pl
from jax.experimental.pallas import tpu as pltpu

NEG = -1e30  # finite "-inf" stand-in; survives +bias and relu cleanly (f32)


def _round_up(x, m):
    return ((x + m - 1) // m) * m


def _vmem_limit_bytes():
    # ~3/4 of physical VMEM, capped at 100 MiB (v5e/v6e: 128 MiB, v7x: 64 MiB)
    try:
        cap = pltpu.get_tpu_info().vmem_capacity_bytes
    except Exception:
        cap = 64 * 1024 * 1024
    return int(min(cap * 3 // 4, 100 * 1024 * 1024))


# --------------------------------------------------------------------------
# stage 1: fused conv filter bank + streamed global max over time
# --------------------------------------------------------------------------
def make_stream_kernel(Bt, Tt, H, Cin, Wm, F, T):
    tmax_min = T - Wm  # largest conv start position valid for ALL filters

    def kernel(xm_ref, xh_ref, wc_ref, tmax_ref, pooled_ref, mx_ref, xe_ref):
        t = pl.program_id(1)

        # init the streamed time-max on the first time tile of each batch tile
        @pl.when(t == 0)
        def _():
            mx_ref[...] = jnp.full((Bt, F), NEG, jnp.float32)

        # assemble the (Bt, Tt + H, Cin) halo window in VMEM scratch
        # (both stores are sublane-aligned: Tt and H are multiples of 8)
        xe_ref[:, :Tt, :] = xm_ref[...]
        xe_ref[:, Tt:, :] = xh_ref[...]

        # fused filter bank: Wm shifted MXU dots accumulated in f32
        s = jnp.zeros((Bt * Tt, F), jnp.float32)
        for k in range(Wm):
            xk = xe_ref[:, k:k + Tt, :].reshape(Bt * Tt, Cin)
            s = s + jnp.dot(xk, wc_ref[k * Cin:(k + 1) * Cin, :],
                            preferred_element_type=jnp.float32)
        s = s.reshape(Bt, Tt, F)

        # streamed global max over time; the per-lane validity mask only runs
        # on tiles that can contain invalid start positions
        needs_mask = (t * Tt + (Tt - 1)) > tmax_min

        @pl.when(needs_mask)
        def _():
            pos = t * Tt + jax.lax.broadcasted_iota(jnp.int32, (Tt, F), 0)
            valid = pos <= tmax_ref[...]                       # (Tt, F)
            sm = jnp.where(valid[None], s, NEG)
            mx_ref[...] = jnp.maximum(mx_ref[...], jnp.max(sm, axis=1))

        @pl.when(jnp.logical_not(needs_mask))
        def _():
            mx_ref[...] = jnp.maximum(mx_ref[...], jnp.max(s, axis=1))

        @pl.when(t == pl.num_programs(1) - 1)
        def _():
            pooled_ref[...] = mx_ref[...]

    return kernel


# --------------------------------------------------------------------------
# stage 2: conv bias + relu -> highway layers -> output projection
# --------------------------------------------------------------------------
def make_epilogue_kernel(n_hw):
    def kernel(pooled_ref, bc_ref, *refs):
        if n_hw > 0:
            whh_ref, whg_ref, bhh_ref, bhg_ref, wo_ref, bo_ref, out_ref = refs
        else:
            wo_ref, bo_ref, out_ref = refs
        h = jnp.maximum(pooled_ref[...] + bc_ref[...], 0.0)
        for l in range(n_hw):
            zh = jnp.dot(h, whh_ref[l],
                         preferred_element_type=jnp.float32) + bhh_ref[l]
            zg = jnp.dot(h, whg_ref[l],
                         preferred_element_type=jnp.float32) + bhg_ref[l]
            new_x = jnp.maximum(zh, 0.0)
            gate = jax.nn.sigmoid(zg)
            h = gate * h + (1.0 - gate) * new_x
        out = jnp.dot(h, wo_ref[...],
                      preferred_element_type=jnp.float32) + bo_ref[...]
        out_ref[...] = out.astype(out_ref.dtype)

    return kernel


def cnn_encoder_forward(x, params, filters, output_dim, highway_layers,
                        batch_tile=8, time_tile=128, mxu_dtype=jnp.float32):
    B, T, Cin = x.shape
    widths = [w for w, _ in filters]
    Wm = max(widths)
    assert T >= Wm, "sequence length must cover the widest filter"
    F = sum(oc for _, oc in filters)
    O = output_dim
    f32 = jnp.float32

    # ---- tile sizes (all multiples of 8; halo H covers the extra Wm-1 rows) --
    H = max(8, _round_up(Wm - 1, 8))
    Tt = _round_up(max(min(time_tile, T), 1), H)     # Tt % H == 0, Tt % 8 == 0
    Tp = _round_up(T, Tt)
    nt = Tp // Tt

    Bt = _round_up(max(min(batch_tile, B), 1), 8)    # streaming batch tile
    Bt2 = _round_up(min(max(B, 1), 256), Bt)         # epilogue batch tile
    Bp = _round_up(B, Bt2)                           # multiple of Bt and Bt2
    nb = Bp // Bt
    nb2 = Bp // Bt2

    # ---- raw x, zero-padded for batch/time tiling + halo (NO im2col) --------
    x_pad = jnp.zeros((Bp, Tp + H, Cin), mxu_dtype)
    x_pad = x_pad.at[:B, :T, :].set(x.astype(mxu_dtype))

    # ---- fused conv-bank weight / bias / per-lane last-valid-start index ----
    wc = jnp.zeros((Wm * Cin, F), f32)
    bc = jnp.zeros((1, F), f32)
    tmax = jnp.zeros((1, F), jnp.int32)
    off = 0
    for i, (w, oc) in enumerate(filters):
        wi = params["conv_w"][i].astype(f32).reshape(w * Cin, oc)
        wc = wc.at[:w * Cin, off:off + oc].set(wi)
        bc = bc.at[:, off:off + oc].set(params["conv_b"][i].astype(f32))
        tmax = tmax.at[:, off:off + oc].set(T - w)   # last valid start index
        off += oc
    wc = wc.astype(mxu_dtype)

    # ---- highway weights split into relu / gate halves (only if layers) -----
    hw_args = []
    if highway_layers > 0:
        Ls = highway_layers
        whh = jnp.stack([params["hw_w"][l].astype(f32)[:, :F] for l in range(Ls)])
        whg = jnp.stack([params["hw_w"][l].astype(f32)[:, F:] for l in range(Ls)])
        bhh = jnp.stack([params["hw_b"][l].astype(f32)[:, :F] for l in range(Ls)])
        bhg = jnp.stack([params["hw_b"][l].astype(f32)[:, F:] for l in range(Ls)])
        hw_args = [whh, whg, bhh, bhg]

    wo = params["op_w"].astype(f32)
    bo = params["op_b"].astype(f32)

    vmem_limit = _vmem_limit_bytes()

    # --------------- stage 1: streamed conv bank + time max-pool -------------
    pooled = pl.pallas_call(
        make_stream_kernel(Bt, Tt, H, Cin, Wm, F, T),
        out_shape=jax.ShapeDtypeStruct((Bp, F), f32),
        grid_spec=pltpu.PrefetchScalarGridSpec(
            num_scalar_prefetch=0,
            grid=(nb, nt),
            in_specs=[
                # main x tile
                pl.BlockSpec((Bt, Tt, Cin), lambda i, t: (i, t, 0)),
                # halo: first H rows of the next time tile (element offset
                # (t+1)*Tt, expressed in H-sized blocks)
                pl.BlockSpec((Bt, H, Cin),
                             lambda i, t: (i, (t + 1) * (Tt // H), 0)),
                # fused conv weight + per-lane valid range: constant blocks,
                # single-buffered to save VMEM
                pl.BlockSpec((Wm * Cin, F), lambda i, t: (0, 0),
                             pipeline_mode=pl.Buffered(1)),
                pl.BlockSpec((1, F), lambda i, t: (0, 0),
                             pipeline_mode=pl.Buffered(1)),
            ],
            out_specs=pl.BlockSpec((Bt, F), lambda i, t: (i, 0)),
            scratch_shapes=[
                pltpu.VMEM((Bt, F), jnp.float32),           # running max
                pltpu.VMEM((Bt, Tt + H, Cin), mxu_dtype),   # halo window
            ],
        ),
        compiler_params=pltpu.CompilerParams(
            dimension_semantics=("parallel", "arbitrary"),
            vmem_limit_bytes=vmem_limit),
    )(x_pad, x_pad, wc, tmax)

    # --------------- stage 2: bias + relu -> highway -> projection -----------
    epi_in_specs = [
        pl.BlockSpec((Bt2, F), lambda i: (i, 0)),
        pl.BlockSpec((1, F), lambda i: (0, 0), pipeline_mode=pl.Buffered(1)),
    ]
    if highway_layers > 0:
        Ls = highway_layers
        epi_in_specs += [
            pl.BlockSpec((Ls, F, F), lambda i: (0, 0, 0),
                         pipeline_mode=pl.Buffered(1)),
            pl.BlockSpec((Ls, F, F), lambda i: (0, 0, 0),
                         pipeline_mode=pl.Buffered(1)),
            pl.BlockSpec((Ls, 1, F), lambda i: (0, 0, 0),
                         pipeline_mode=pl.Buffered(1)),
            pl.BlockSpec((Ls, 1, F), lambda i: (0, 0, 0),
                         pipeline_mode=pl.Buffered(1)),
        ]
    epi_in_specs += [
        pl.BlockSpec((F, O), lambda i: (0, 0), pipeline_mode=pl.Buffered(1)),
        pl.BlockSpec((1, O), lambda i: (0, 0), pipeline_mode=pl.Buffered(1)),
    ]

    out = pl.pallas_call(
        make_epilogue_kernel(highway_layers),
        out_shape=jax.ShapeDtypeStruct((Bp, O), f32),
        grid_spec=pltpu.PrefetchScalarGridSpec(
            num_scalar_prefetch=0,
            grid=(nb2,),
            in_specs=epi_in_specs,
            out_specs=pl.BlockSpec((Bt2, O), lambda i: (i, 0)),
        ),
        compiler_params=pltpu.CompilerParams(
            dimension_semantics=("parallel",),
            vmem_limit_bytes=vmem_limit),
    )(pooled, bc, *hw_args, wo, bo)

    return out[:B]


# --------------------------------------------------------------------------
# pure-JAX reference (same math as the PyTorch module) + param init
# --------------------------------------------------------------------------
def reference_forward(x, params, filters, output_dim, highway_layers):
    B, T, Cin = x.shape
    final_dim = sum(oc for _, oc in filters)
    feats = []
    for i, (width, oc) in enumerate(filters):
        W = params["conv_w"][i]          # (width, Cin, oc)
        b = params["conv_b"][i]          # (1, oc)
        T_out = T - width + 1
        y = jnp.zeros((B, T_out, oc), jnp.float32)
        for k in range(width):
            y = y + jnp.einsum("btc,co->bto", x[:, k:k + T_out, :], W[k])
        y = y + b
        y = jnp.maximum(jnp.max(y, axis=1), 0.0)
        feats.append(y)
    h = jnp.concatenate(feats, axis=-1)
    for l in range(highway_layers):
        z = h @ params["hw_w"][l] + params["hw_b"][l]
        new_x = jnp.maximum(z[:, :final_dim], 0.0)
        gate = jax.nn.sigmoid(z[:, final_dim:])
        h = gate * h + (1.0 - gate) * new_x
    return h @ params["op_w"] + params["op_b"]


def init_params(key, filters, input_dim, output_dim, highway_layers):
    final_dim = sum(oc for _, oc in filters)
    keys = jax.random.split(key, 2 * len(filters) + max(highway_layers, 0) + 1)
    conv_w, conv_b = [], []
    for i, (width, oc) in enumerate(filters):
        conv_w.append(0.1 * jax.random.normal(keys[2 * i],
                                              (width, input_dim, oc), jnp.float32))
        conv_b.append(0.1 * jax.random.normal(keys[2 * i + 1], (1, oc), jnp.float32))
    hw_w, hw_b = [], []
    for l in range(highway_layers):
        # nn.Linear(final_dim, 2*final_dim): weight ~ N(0, 0.02),
        # bias[:final_dim] = 0 (new_x half), bias[final_dim:] = 1 (gate half)
        hw_w.append(0.02 * jax.random.normal(keys[2 * len(filters) + l],
                                             (final_dim, 2 * final_dim), jnp.float32))
        hw_b.append(jnp.concatenate([jnp.zeros((1, final_dim), jnp.float32),
                                     jnp.ones((1, final_dim), jnp.float32)], axis=-1))
    op_w = 0.02 * jax.random.normal(keys[-1], (final_dim, output_dim), jnp.float32)
    op_b = jnp.zeros((1, output_dim), jnp.float32)
    return {"conv_w": conv_w, "conv_b": conv_b,
            "hw_w": hw_w, "hw_b": hw_b,
            "op_w": op_w, "op_b": op_b}


if __name__ == "__main__":
    # config 1: 2 time tiles so conv windows cross a tile boundary (halo path)
    B, T, input_dim = 2, 12, 8
    filters = [(2, 4), (3, 8)]          # (kernel width, out channels)
    output_dim = 16
    highway_layers = 1

    kx, kp = jax.random.split(jax.random.PRNGKey(0))
    x = jax.random.normal(kx, (B, T, input_dim), jnp.float32)
    params = init_params(kp, filters, input_dim, output_dim, highway_layers)

    out = jax.block_until_ready(
        cnn_encoder_forward(x, params, filters, output_dim, highway_layers,
                            time_tile=8))
    ref = reference_forward(x, params, filters, output_dim, highway_layers)
    assert out.shape == (B, output_dim)
    np.testing.assert_allclose(np.asarray(out), np.asarray(ref),
                               rtol=1e-4, atol=1e-5)

    # config 2: mixed filter widths, 2 highway layers, 3 time tiles + masking
    B2, T2, in2 = 3, 19, 5
    filters2 = [(1, 3), (2, 6), (5, 7)]
    out_dim2, hw2 = 10, 2
    k2x, k2p = jax.random.split(jax.random.PRNGKey(1))
    x2 = jax.random.normal(k2x, (B2, T2, in2), jnp.float32)
    p2 = init_params(k2p, filters2, in2, out_dim2, hw2)
    o2 = jax.block_until_ready(
        cnn_encoder_forward(x2, p2, filters2, out_dim2, hw2, time_tile=8))
    r2 = reference_forward(x2, p2, filters2, out_dim2, hw2)
    np.testing.assert_allclose(np.asarray(o2), np.asarray(r2),
                               rtol=1e-4, atol=1e-5)

    # config 3: no highway layers + bf16 MXU operands for the conv stage
    B3, T3, in3 = 2, 16, 8
    filters3 = [(3, 5)]
    out_dim3, hw3 = 9, 0
    k3x, k3p = jax.random.split(jax.random.PRNGKey(2))
    x3 = jax.random.normal(k3x, (B3, T3, in3), jnp.float32)
    p3 = init_params(k3p, filters3, in3, out_dim3, hw3)
    o3 = jax.block_until_ready(
        cnn_encoder_forward(x3, p3, filters3, out_dim3, hw3,
                            mxu_dtype=jnp.bfloat16))
    r3 = reference_forward(x3, p3, filters3, out_dim3, hw3)
    np.testing.assert_allclose(np.asarray(o3), np.asarray(r3),
                               rtol=3e-2, atol=3e-2)

    print("KERNEL_OK")
</pallas_src>

<mosaic_0001>
module attributes {stable_mosaic.version = 11 : i64} {
  func.func @kernel(%arg0: i32, %arg1: i32, %arg2: memref<8x8x8xf32, #tpu.memory_space<vmem>>, %arg3: memref<8x8x8xf32, #tpu.memory_space<vmem>>, %arg4: memref<24x12xf32, #tpu.memory_space<vmem>>, %arg5: memref<1x12xi32, #tpu.memory_space<vmem>>, %arg6: memref<8x12xf32, #tpu.memory_space<vmem>>, %arg7: memref<8x12xf32, #tpu.memory_space<vmem>>, %arg8: memref<8x16x8xf32, #tpu.memory_space<vmem>>) attributes {dimension_semantics = [#tpu.dimension_semantics<parallel>, #tpu.dimension_semantics<arbitrary>], iteration_bounds = array<i64: 1, 2>, scalar_prefetch = 0 : i64, scratch_operands = 2 : i64, tpu.core_type = #tpu.core_type<tc>, window_params = [{transform_indices = @transform_0, window_bounds = array<i64: 8, 8, 8>}, {transform_indices = @transform_1, window_bounds = array<i64: 8, 8, 8>}, {pipeline_mode = #tpu.pipeline_mode<synchronous>, transform_indices = @transform_2, window_bounds = array<i64: 24, 12>}, {pipeline_mode = #tpu.pipeline_mode<synchronous>, transform_indices = @transform_3, window_bounds = array<i64: 1, 12>}, {transform_indices = @transform_4, window_bounds = array<i64: 8, 12>}]} {
    %c0_i32 = arith.constant 0 : i32
    %0 = arith.cmpi eq, %arg1, %c0_i32 : i32
    %1 = arith.extui %0 : i1 to i32
    %c0_i32_0 = arith.constant 0 : i32
    %2 = arith.cmpi ne, %1, %c0_i32_0 : i32
    scf.if %2 {
      %cst_29 = arith.constant -1.000000e+30 : f32
      %35 = vector.broadcast %cst_29 : f32 to vector<8x12xf32>
      %c0_30 = arith.constant 0 : index
      %c0_31 = arith.constant 0 : index
      %36 = vector.load %arg7[%c0_30, %c0_31] : memref<8x12xf32, #tpu.memory_space<vmem>>, vector<8x12xf32>
      tpu.vector_store %arg7[%c0_30, %c0_31], %35 {strides = array<i32>} : memref<8x12xf32, #tpu.memory_space<vmem>>, vector<8x12xf32>,
    } else {
    }
    %c0 = arith.constant 0 : index
    %c0_1 = arith.constant 0 : index
    %c0_2 = arith.constant 0 : index
    %3 = vector.load %arg2[%c0, %c0_1, %c0_2] : memref<8x8x8xf32, #tpu.memory_space<vmem>>, vector<8x8x8xf32>
    %c0_3 = arith.constant 0 : index
    %c0_4 = arith.constant 0 : index
    %c0_5 = arith.constant 0 : index
    %4 = vector.load %arg8[%c0_3, %c0_4, %c0_5] : memref<8x16x8xf32, #tpu.memory_space<vmem>>, vector<8x8x8xf32>
    tpu.vector_store %arg8[%c0_3, %c0_4, %c0_5], %3 {strides = array<i32>} : memref<8x16x8xf32, #tpu.memory_space<vmem>>, vector<8x8x8xf32>,
    %c0_6 = arith.constant 0 : index
    %c0_7 = arith.constant 0 : index
    %c0_8 = arith.constant 0 : index
    %5 = vector.load %arg3[%c0_6, %c0_7, %c0_8] : memref<8x8x8xf32, #tpu.memory_space<vmem>>, vector<8x8x8xf32>
    %c0_9 = arith.constant 0 : index
    %c8 = arith.constant 8 : index
    %c0_10 = arith.constant 0 : index
    %6 = vector.load %arg8[%c0_9, %c8, %c0_10] : memref<8x16x8xf32, #tpu.memory_space<vmem>>, vector<8x8x8xf32>
    tpu.vector_store %arg8[%c0_9, %c8, %c0_10], %5 {strides = array<i32>} : memref<8x16x8xf32, #tpu.memory_space<vmem>>, vector<8x8x8xf32>,
    %cst = arith.constant 0.000000e+00 : f32
    %7 = vector.broadcast %cst : f32 to vector<64x12xf32>
    %c0_11 = arith.constant 0 : index
    %c0_12 = arith.constant 0 : index
    %c0_13 = arith.constant 0 : index
    %8 = vector.load %arg8[%c0_11, %c0_12, %c0_13] : memref<8x16x8xf32, #tpu.memory_space<vmem>>, vector<8x8x8xf32>
    %9 = vector.shape_cast %8 : vector<8x8x8xf32> to vector<64x8xf32>
    %c0_14 = arith.constant 0 : index
    %c0_15 = arith.constant 0 : index
    %10 = vector.load %arg4[%c0_14, %c0_15] : memref<24x12xf32, #tpu.memory_space<vmem>>, vector<8x12xf32>
    %cst_16 = arith.constant dense<0.000000e+00> : vector<64x12xf32>
    %11 = tpu.matmul %9, %10, %cst_16 {dimension_numbers = #tpu.dot_dimension_numbers<[1], [0], [0], [1], [0, 0, 1, 1], [], []>} : vector<64x8xf32>, vector<8x12xf32>, vector<64x12xf32> -> vector<64x12xf32>
    %12 = arith.addf %7, %11 : vector<64x12xf32>
    %c0_17 = arith.constant 0 : index
    %c1 = arith.constant 1 : index
    %c0_18 = arith.constant 0 : index
    %13 = vector.load %arg8[%c0_17, %c1, %c0_18] : memref<8x16x8xf32, #tpu.memory_space<vmem>>, vector<8x8x8xf32>
    %14 = vector.shape_cast %13 : vector<8x8x8xf32> to vector<64x8xf32>
    %c8_19 = arith.constant 8 : index
    %c0_20 = arith.constant 0 : index
    %15 = vector.load %arg4[%c8_19, %c0_20] : memref<24x12xf32, #tpu.memory_space<vmem>>, vector<8x12xf32>
    %cst_21 = arith.constant dense<0.000000e+00> : vector<64x12xf32>
    %16 = tpu.matmul %14, %15, %cst_21 {dimension_numbers = #tpu.dot_dimension_numbers<[1], [0], [0], [1], [0, 0, 1, 1], [], []>} : vector<64x8xf32>, vector<8x12xf32>, vector<64x12xf32> -> vector<64x12xf32>
    %17 = arith.addf %12, %16 : vector<64x12xf32>
    %c0_22 = arith.constant 0 : index
    %c2 = arith.constant 2 : index
    %c0_23 = arith.constant 0 : index
    %18 = vector.load %arg8[%c0_22, %c2, %c0_23] : memref<8x16x8xf32, #tpu.memory_space<vmem>>, vector<8x8x8xf32>
    %19 = vector.shape_cast %18 : vector<8x8x8xf32> to vector<64x8xf32>
    %c16 = arith.constant 16 : index
    %c0_24 = arith.constant 0 : index
    %20 = vector.load %arg4[%c16, %c0_24] : memref<24x12xf32, #tpu.memory_space<vmem>>, vector<8x12xf32>
    %cst_25 = arith.constant dense<0.000000e+00> : vector<64x12xf32>
    %21 = tpu.matmul %19, %20, %cst_25 {dimension_numbers = #tpu.dot_dimension_numbers<[1], [0], [0], [1], [0, 0, 1, 1], [], []>} : vector<64x8xf32>, vector<8x12xf32>, vector<64x12xf32> -> vector<64x12xf32>
    %22 = arith.addf %17, %21 : vector<64x12xf32>
    %23 = vector.shape_cast %22 : vector<64x12xf32> to vector<8x8x12xf32>
    %c8_i32 = arith.constant 8 : i32
    %24 = arith.muli %arg1, %c8_i32 : i32
    %c7_i32 = arith.constant 7 : i32
    %25 = arith.addi %24, %c7_i32 : i32
    %c9_i32 = arith.constant 9 : i32
    %26 = arith.cmpi sgt, %25, %c9_i32 : i32
    %27 = arith.extui %26 : i1 to i32
    %c0_i32_26 = arith.constant 0 : i32
    %28 = arith.cmpi ne, %27, %c0_i32_26 : i32
    scf.if %28 {
      %c8_i32_29 = arith.constant 8 : i32
      %35 = arith.muli %arg1, %c8_i32_29 : i32
      %36 = tpu.iota {dimensions = array<i32: 0>} : vector<8x12xi32>
      %37 = vector.broadcast %35 : i32 to vector<8x12xi32>
      %38 = arith.addi %37, %36 : vector<8x12xi32>
      %c0_30 = arith.constant 0 : index
      %c0_31 = arith.constant 0 : index
      %39 = vector.load %arg5[%c0_30, %c0_31] : memref<1x12xi32, #tpu.memory_space<vmem>>, vector<1x12xi32>
      %40 = vector.broadcast %39 : vector<1x12xi32> to vector<8x12xi32>
      %41 = arith.cmpi sle, %38, %40 : vector<8x12xi32>
      %42 = vector.shape_cast %41 : vector<8x12xi1> to vector<1x8x12xi1>
      %cst_32 = arith.constant -1.000000e+30 : f32
      %43 = vector.shape_cast %42 : vector<1x8x12xi1> to vector<1x8x12xi1>
      %44 = vector.broadcast %43 : vector<1x8x12xi1> to vector<8x8x12xi1>
      %45 = vector.broadcast %cst_32 : f32 to vector<8x8x12xf32>
      %46 = arith.select %44, %23, %45 : vector<8x8x12xi1>, vector<8x8x12xf32>
      %c0_33 = arith.constant 0 : index
      %c0_34 = arith.constant 0 : index
      %47 = vector.load %arg7[%c0_33, %c0_34] : memref<8x12xf32, #tpu.memory_space<vmem>>, vector<8x12xf32>
      %cst_35 = arith.constant dense<0xFF800000> : vector<8x12xf32>
      %48 = vector.multi_reduction <maximumf>, %46, %cst_35 [1] : vector<8x8x12xf32> to vector<8x12xf32>
      %49 = arith.maximumf %47, %48 : vector<8x12xf32>
      %c0_36 = arith.constant 0 : index
      %c0_37 = arith.constant 0 : index
      %50 = vector.load %arg7[%c0_36, %c0_37] : memref<8x12xf32, #tpu.memory_space<vmem>>, vector<8x12xf32>
      tpu.vector_store %arg7[%c0_36, %c0_37], %49 {strides = array<i32>} : memref<8x12xf32, #tpu.memory_space<vmem>>, vector<8x12xf32>,
    } else {
    }
    %true = arith.constant true
    %29 = arith.xori %26, %true : i1
    %30 = arith.extui %29 : i1 to i32
    %c0_i32_27 = arith.constant 0 : i32
    %31 = arith.cmpi ne, %30, %c0_i32_27 : i32
    scf.if %31 {
      %c0_29 = arith.constant 0 : index
      %c0_30 = arith.constant 0 : index
      %35 = vector.load %arg7[%c0_29, %c0_30] : memref<8x12xf32, #tpu.memory_space<vmem>>, vector<8x12xf32>
      %cst_31 = arith.constant dense<0xFF800000> : vector<8x12xf32>
      %36 = vector.multi_reduction <maximumf>, %23, %cst_31 [1] : vector<8x8x12xf32> to vector<8x12xf32>
      %37 = arith.maximumf %35, %36 : vector<8x12xf32>
      %c0_32 = arith.constant 0 : index
      %c0_33 = arith.constant 0 : index
      %38 = vector.load %arg7[%c0_32, %c0_33] : memref<8x12xf32, #tpu.memory_space<vmem>>, vector<8x12xf32>
      tpu.vector_store %arg7[%c0_32, %c0_33], %37 {strides = array<i32>} : memref<8x12xf32, #tpu.memory_space<vmem>>, vector<8x12xf32>,
    } else {
    }
    %c1_i32 = arith.constant 1 : i32
    %32 = arith.cmpi eq, %arg1, %c1_i32 : i32
    %33 = arith.extui %32 : i1 to i32
    %c0_i32_28 = arith.constant 0 : i32
    %34 = arith.cmpi ne, %33, %c0_i32_28 : i32
    scf.if %34 {
      %c0_29 = arith.constant 0 : index
      %c0_30 = arith.constant 0 : index
      %35 = vector.load %arg7[%c0_29, %c0_30] : memref<8x12xf32, #tpu.memory_space<vmem>>, vector<8x12xf32>
      %c0_31 = arith.constant 0 : index
      %c0_32 = arith.constant 0 : index
      %36 = vector.load %arg6[%c0_31, %c0_32] : memref<8x12xf32, #tpu.memory_space<vmem>>, vector<8x12xf32>
      tpu.vector_store %arg6[%c0_31, %c0_32], %35 {strides = array<i32>} : memref<8x12xf32, #tpu.memory_space<vmem>>, vector<8x12xf32>,
    } else {
    }
    return
  }
  func.func @transform_0(%arg0: i32, %arg1: i32) -> (i32, i32, i32) {
    %c0_i32 = arith.constant 0 : i32
    %c0_i32_0 = arith.constant 0 : i32
    return %arg0, %arg1, %c0_i32 : i32, i32, i32
  }
  func.func @transform_1(%arg0: i32, %arg1: i32) -> (i32, i32, i32) {
    %c1_i32 = arith.constant 1 : i32
    %0 = arith.addi %arg1, %c1_i32 : i32
    %c1_i32_0 = arith.constant 1 : i32
    %1 = arith.muli %0, %c1_i32_0 : i32
    %c0_i32 = arith.constant 0 : i32
    %c0_i32_1 = arith.constant 0 : i32
    return %arg0, %1, %c0_i32 : i32, i32, i32
  }
  func.func @transform_2(%arg0: i32, %arg1: i32) -> (i32, i32) {
    %c0_i32 = arith.constant 0 : i32
    %c0_i32_0 = arith.constant 0 : i32
    %c0_i32_1 = arith.constant 0 : i32
    return %c0_i32, %c0_i32_0 : i32, i32
  }
  func.func @transform_3(%arg0: i32, %arg1: i32) -> (i32, i32) {
    %c0_i32 = arith.constant 0 : i32
    %c0_i32_0 = arith.constant 0 : i32
    %c0_i32_1 = arith.constant 0 : i32
    return %c0_i32, %c0_i32_0 : i32, i32
  }
  func.func @transform_4(%arg0: i32, %arg1: i32) -> (i32, i32) {
    %c0_i32 = arith.constant 0 : i32
    %c0_i32_0 = arith.constant 0 : i32
    return %arg0, %c0_i32 : i32, i32
  }
}

</mosaic_0001>

<bundles_post_ra>
// kernel: tpu_custom_call.1
= control target key start
LH: loop header
LB: loop body
LE: loop exit
PB: predicated region body
PF: predicated region fallthrough
CT: control target
= control target key end

     0   :  { %9 = vsyncpa [#allocation7], 0  ;;  %s1429_s15 = smov 0   ;;  %s1431_s16 = smov 0   ;;  %s1708_s0 = inlined_call_operand.vmem [shape: f32[8,24,8], index: 0, kind: input, shape index: {}]   ;;  %s1709_s1 = inlined_call_operand.vmem [shape: f32[8,24,8], index: 1, kind: input, shape index: {}]   ;;  %s1710_s2 = inlined_call_operand.vmem [shape: f32[24,12], index: 2, kind: input, shape index: {}]   ;;  %s1711_s3 = inlined_call_operand.vmem [shape: s32[1,12], index: 3, kind: input, shape index: {}]   ;;  %s1712_s4 = inlined_call_operand.hbm [shape: f32[8,12], index: 4, kind: output, shape index: {}]  }
   0x1   :  { %s1433_s17 = smov 0   ;;  %s1435_s18 = smov 0  }
   0x2   :  { %s1437_s19 = smov 0   ;;  %s1439_s20 = smov 0  }
   0x3   :  { %s1441_s21 = smov 0  }
   0x4 LB: > { %s1113_s22 = sadd.s32 4294967295, %s1400_s21   ;;  %s24_s23 = sadd.s32 1, %s1396_s20  ;;  %s1400_s21 = sphi %s1441_s21, %s15_s21   ;;  %s1396_s20 = sphi %s1439_s20, %s1722_s20   ;;  %s1392_s19 = sphi %s1437_s19, %s1721_s19   ;;  %s1388_s18 = sphi %s1435_s18, %s1720_s18   ;;  %s1384_s17 = sphi %s1433_s17, %s1719_s17   ;;  %s1380_s16 = sphi %s1431_s16, %s1718_s16   ;;  %s1376_s15 = sphi %s1429_s15, %s1717_s15  }
   0x5   : > { %p25_p0 = scmp.ge.s32.totalorder %s24_s23, 2  ;;  %s36_s24 = sadd.s32 1, %s1388_s18 }
   0x6   : > { %p43_p1 = scmp.ne.s32.totalorder %s1388_s18, %s1384_s17  ;;  %p44_p2 = scmp.eq.s32.totalorder %s1400_s21, 0 }
   0x7   : > { %s1470_s25 = scalar_select %p25_p0, 0, %s24_s23  }
   0x8   : > { %p45_p3 = por %p44_p2, %p43_p1  ;;  %s66_s26 = sadd.s32 1, %s1380_s16 }
   0x9   : > { %s32_s27 = ssub.s32 %s1396_s20, %s1470_s25  ;;  %s60_s28 = sadd.s32 1, %s1470_s25 }
   0xa   : > { %p34_p4 = scmp.eq.s32.totalorder %s32_s27, 0  ;;  %s62_s29 = ssub.s32 %s24_s23, %s60_s28 }
   0xb   : > { %p64_p5 = scmp.eq.s32.totalorder %s62_s29, 0  ;;  %p73_p6 = scmp.ne.s32.totalorder %s1380_s16, %s1376_s15 }
   0xc   : > { %s1479_s30 = scalar_select %p34_p4, %s1388_s18, %s36_s24  }
   0xd   : > { %s1482_s5 = scalar_select %p64_p5, %s1380_s16, %s66_s26  }
   0xe   : > { %p1484_p7 = por %p73_p6, %p44_p2  ;;  %p1115_p8 = scmp.ge.s32.totalorder %s1400_s21, 2 }
  0x10   : > { %173 = sbr.rel (%p1115_p8) target bundleno = 39 (0x27), region = 24 }
  0x17   : > { %176 = sbr.rel (!%p45_p3) target bundleno = 31 (0x1f), region = 28  ;;  %s178_s7 = sand.u32 (%p45_p3), 1, %s1388_s18  }
  0x18   : > { %s1117_s8 = sshll.u32 (%p45_p3), %s1396_s20, 3  ;;  %s1116_s9 = sshll.u32 (%p45_p3), %s178_s7, 6 }
  0x19   : > { %s185_s12 = scalar_lea.vmem (%p45_p3), %s1708_s0, %s1117_s8  ;;  %s180_s13 = scalar_lea.vmem (%p45_p3), [#allocation4], %s1116_s9 }
  0x1a   : > { %v227_v0 = vld [vmem:[%s185_s12] sm:$0xff] (%p45_p3)  ;;  %v229_v1 = vld [vmem:[%s185_s12 + $0x18] sm:$0xff] (%p45_p3)  ;;  %v231_v2 = vld [vmem:[%s185_s12 + $0x30] sm:$0xff] (%p45_p3) }
  0x1b   : > { %228 = vst [vmem:[%s180_s13] sm:$0xff] (%p45_p3), %v227_v0  ;;  %230 = vst [vmem:[%s180_s13 + $0x8] sm:$0xff] (%p45_p3), %v229_v1  ;;  %v233_v3 = vld [vmem:[%s185_s12 + $0x48] sm:$0xff] (%p45_p3)  ;;  %v235_v4 = vld [vmem:[%s185_s12 + $0x60] sm:$0xff] (%p45_p3) }
  0x1c   : > { %232 = vst [vmem:[%s180_s13 + $0x10] sm:$0xff] (%p45_p3), %v231_v2  ;;  %v237_v5 = vld [vmem:[%s185_s12 + $0x78] sm:$0xff] (%p45_p3)  ;;  %234 = vst [vmem:[%s180_s13 + $0x18] sm:$0xff] (%p45_p3), %v233_v3  ;;  %v239_v6 = vld [vmem:[%s185_s12 + $0x90] sm:$0xff] (%p45_p3) }
  0x1d   : > { %236 = vst [vmem:[%s180_s13 + $0x20] sm:$0xff] (%p45_p3), %v235_v4  ;;  %238 = vst [vmem:[%s180_s13 + $0x28] sm:$0xff] (%p45_p3), %v237_v5  ;;  %v241_v7 = vld [vmem:[%s185_s12 + $0xa8] sm:$0xff] (%p45_p3) }
  0x1e   : > { %240 = vst [vmem:[%s180_s13 + $0x30] sm:$0xff] %v239_v6  ;;  %242 = vst [vmem:[%s180_s13 + $0x38] sm:$0xff] %v241_v7 }
  0x1f PF: > { %248 = sbr.rel (!%p1484_p7) target bundleno = 39 (0x27), region = 66  ;;  %s250_s14 = sand.u32 (%p1484_p7), 1, %s1380_s16  }
  0x20   : > { %s1119_s23 = sshll.u32 (%p1484_p7), %s1396_s20, 3  ;;  %s1118_s24 = sshll.u32 (%p1484_p7), %s250_s14, 6 }
  0x21   : > { %s1061_s28 = scalar_lea.vmem (%p1484_p7), %s1709_s1, %s1119_s23  ;;  %s252_s29 = scalar_lea.vmem (%p1484_p7), [#allocation5], %s1118_s24 }
  0x22   : > { %v1120_v8 = vld [vmem:[%s1061_s28 + $0x8] sm:$0xff] (%p1484_p7)  ;;  %v1121_v9 = vld [vmem:[%s1061_s28 + $0x20] sm:$0xff] (%p1484_p7)  ;;  %v1122_v10 = vld [vmem:[%s1061_s28 + $0x38] sm:$0xff] (%p1484_p7) }
  0x23   : > { %301 = vst [vmem:[%s252_s29] sm:$0xff] (%p1484_p7), %v1120_v8  ;;  %303 = vst [vmem:[%s252_s29 + $0x8] sm:$0xff] (%p1484_p7), %v1121_v9  ;;  %v1123_v11 = vld [vmem:[%s1061_s28 + $0x50] sm:$0xff] (%p1484_p7)  ;;  %v1124_v12 = vld [vmem:[%s1061_s28 + $0x68] sm:$0xff] (%p1484_p7) }
  0x24   : > { %305 = vst [vmem:[%s252_s29 + $0x10] sm:$0xff] (%p1484_p7), %v1122_v10  ;;  %v1125_v13 = vld [vmem:[%s1061_s28 + $0x80] sm:$0xff] (%p1484_p7)  ;;  %307 = vst [vmem:[%s252_s29 + $0x18] sm:$0xff] (%p1484_p7), %v1123_v11  ;;  %v1126_v14 = vld [vmem:[%s1061_s28 + $0x98] sm:$0xff] (%p1484_p7) }
  0x25   : > { %309 = vst [vmem:[%s252_s29 + $0x20] sm:$0xff] (%p1484_p7), %v1124_v12  ;;  %311 = vst [vmem:[%s252_s29 + $0x28] sm:$0xff] (%p1484_p7), %v1125_v13  ;;  %v1127_v15 = vld [vmem:[%s1061_s28 + $0xb0] sm:$0xff] (%p1484_p7) }
  0x26   : > { %313 = vst [vmem:[%s252_s29 + $0x30] sm:$0xff] %v1126_v14  ;;  %315 = vst [vmem:[%s252_s29 + $0x38] sm:$0xff] %v1127_v15 }
  0x27 PF: > { %p1128_p9 = scmp.ge.s32.totalorder %s1400_s21, 1  ;;  %p320_p10 = scmp.lt.s32.totalorder %s1400_s21, 3 }
  0x29   : > { %p321_p11 = pnand %p1128_p9, %p320_p10 }
  0x2a   : > { %s327_s6 = sand.u32 (!%p321_p11), 1, %s1384_s17   ;;  %s334_s7 = sand.u32 (!%p321_p11), 1, %s1376_s15  }
  0x2b   : > { %324 = sbr.rel (%p321_p11) target bundleno = 382 (0x17e), region = 104  ;;  %s1129_s8 = sshll.u32 (!%p321_p11), %s327_s6, 6 }
  0x2c   : > { %s1130_s9 = sshll.u32 (!%p321_p11), %s334_s7, 6  ;;  %s1505_s10 = scalar_lea.vmem (!%p321_p11), [#allocation4], %s1129_s8 }
  0x2d   : > { %s1507_s11 = scalar_lea.vmem (!%p321_p11), [#allocation5], %s1130_s9  ;;  %p1131_p12 = scmp.ne.s32.totalorder (!%p321_p11), %s1392_s19, 0 }
  0x32   : > { %364 = sbr.rel (%p1131_p12) target bundleno = 57 (0x39), region = 116  ;;  %vm365_vm0 = vcmask (!%p1131_p12), 97280   ;;  %v1402_v16 = vmov (!%p1131_p12), -1e+30  }
  0x33   : > { %366 = vst.msk [vmem:[#allocation2] sm:$0xff] (!%p1131_p12), %vm365_vm0, %v1402_v16 }
  0x39 PF: > { %v417_v17 = vld [vmem:[%s1710_s2 + $0x8] sm:$0xff]  ;;  %v408_v18 = vld [vmem:[%s1710_s2] sm:$0xff]  ;;  %vm375_vm1 = vcmask 64512   ;;  %v684_v21 = vld [vmem:[%s1710_s2 + $0x10] sm:$0xff]  ;;  %s1156_s24 = sshll.u32 %s1392_s19, 3 }
  0x3a   : > { %v367_v19 = vld [vmem:[%s1505_s10] sm:$0xff]  ;;  %1192 = vmatprep.subr.mxu1 %v417_v17  ;;  %1206 = vmatprep.subr.mxu0 %v408_v18  ;;  %v368_v22 = vld [vmem:[%s1505_s10 + $0x8] sm:$0xff]  ;;  %v369_v24 = vld [vmem:[%s1505_s10 + $0x10] sm:$0xff]  ;;  %s1576_s26 = sadd.s32 7, %s1156_s24 }
  0x3b   : > { %376 = vst.msk [vmem:[#allocation3] sm:$0xff] %vm375_vm1, %v367_v19  ;;  %v384_v20 = vld [vmem:[%s1507_s11] sm:$0xff]  ;;  %1193 = vmatpush3.msra.mxu1 %v417_v17  ;;  %1207 = vmatpush3.msra.mxu0 %v408_v18  ;;  %377 = vst.msk [vmem:[#allocation3 + $0x10] sm:$0xff] %vm375_vm1, %v368_v22  ;;  %v385_v23 = vld [vmem:[%s1507_s11 + $0x8] sm:$0xff]  ;;  %p1157_p13 = scmp.le.s32.totalorder %s1576_s26, 9 }
  0x3c   : > { %392 = vst.msk [vmem:[#allocation3 + $0x8] sm:$0xff] %vm375_vm1, %v384_v20  ;;  %v386_v25 = vld [vmem:[%s1507_s11 + $0x10] sm:$0xff]  ;;  %1234 = vmatprep.subr.mxu1 %v408_v18  ;;  %1220 = vmatprep.subr.mxu0 %v684_v21  ;;  %393 = vst.msk [vmem:[#allocation3 + $0x18] sm:$0xff] %vm375_vm1, %v385_v23  ;;  %v370_v26 = vld [vmem:[%s1505_s10 + $0x18] sm:$0xff]  ;;  %v828_v20 = vlaneseq (!%p1157_p13)  ;;  %vm849_vm3 = vcmask (!%p1157_p13), 97280   ;;  %vm914_vm4 = vcmask (!%p1157_p13), 1041409  }
  0x3d   : > { %378 = vst.msk [vmem:[#allocation3 + $0x20] sm:$0xff] %vm375_vm1, %v369_v24  ;;  %394 = vst.msk [vmem:[#allocation3 + $0x28] sm:$0xff] %vm375_vm1, %v386_v25  ;;  %v387_v27 = vld [vmem:[%s1507_s11 + $0x18] sm:$0xff]  ;;  %v371_v28 = vld [vmem:[%s1505_s10 + $0x20] sm:$0xff]  ;;  %vm916_vm5 = vcmask (!%p1157_p13), 1042434   ;;  %vm918_vm6 = vcmask (!%p1157_p13), 1043459  }
  0x3e   : > { %379 = vst.msk [vmem:[#allocation3 + $0x30] sm:$0xff] %vm375_vm1, %v370_v26  ;;  %395 = vst.msk [vmem:[#allocation3 + $0x38] sm:$0xff] %vm375_vm1, %v387_v27  ;;  %v388_v29 = vld [vmem:[%s1507_s11 + $0x20] sm:$0xff]  ;;  %v372_v30 = vld [vmem:[%s1505_s10 + $0x28] sm:$0xff]  ;;  %v829_v22 = vshrl.u32 (!%p1157_p13), %v828_v20, 7  ;;  %vm920_vm7 = vcmask (!%p1157_p13), 1044484  }
  0x3f   : > { %380 = vst.msk [vmem:[#allocation3 + $0x40] sm:$0xff] %vm375_vm1, %v371_v28  ;;  %v389_v31 = vld [vmem:[%s1507_s11 + $0x28] sm:$0xff]  ;;  %396 = vst.msk [vmem:[#allocation3 + $0x48] sm:$0xff] %vm375_vm1, %v388_v29  ;;  %v373_v32 = vld [vmem:[%s1505_s10 + $0x30] sm:$0xff]  ;;  %vm922_vm8 = vcmask (!%p1157_p13), 1045509   ;;  %vm924_vm9 = vcmask (!%p1157_p13), 1046534  }
  0x40   : > { %381 = vst.msk [vmem:[#allocation3 + $0x50] sm:$0xff] %vm375_vm1, %v372_v30  ;;  %397 = vst.msk [vmem:[#allocation3 + $0x58] sm:$0xff] %vm375_vm1, %v389_v31  ;;  %v390_v33 = vld [vmem:[%s1507_s11 + $0x30] sm:$0xff]  ;;  %v374_v34 = vld [vmem:[%s1505_s10 + $0x38] sm:$0xff]  ;;  %vm926_vm10 = vcmask (!%p1157_p13), 1047559  }
  0x41   : > { %382 = vst.msk [vmem:[#allocation3 + $0x60] sm:$0xff] %vm375_vm1, %v373_v32  ;;  %398 = vst.msk [vmem:[#allocation3 + $0x68] sm:$0xff] %vm375_vm1, %v390_v33  ;;  %v391_v35 = vld [vmem:[%s1507_s11 + $0x38] sm:$0xff] }
  0x42   : > { %383 = vst.msk [vmem:[#allocation3 + $0x70] sm:$0xff] %vm375_vm1, %v374_v34  ;;  %399 = vst.msk [vmem:[#allocation3 + $0x78] sm:$0xff] %vm375_vm1, %v391_v35  ;;  %v400_v36 = vld [vmem:[#allocation3] sm:$0xff]  ;;  %v401_v38 = vld [vmem:[#allocation3 + $0x10] sm:$0xff] }
  0x43   : > { %v409_v37 = vld [vmem:[#allocation3 + $0x1] sm:$0xff]  ;;  %1208 = vmatprep.mubr.msk.f32.mxu0 %vm375_vm1, %v400_v36  ;;  %v410_v39 = vld [vmem:[#allocation3 + $0x11] sm:$0xff] }
  0x44   : > { %1194 = vmatprep.mubr.msk.f32.mxu1 %vm375_vm1, %v409_v37  ;;  %1209 = vmatmul.mubr.msk.f32.vlgmr.msra.gmra.mrb[0].mxu0 %vm375_vm1, %v401_v38  ;;  %v411_v40 = vld [vmem:[#allocation3 + $0x21] sm:$0xff]  ;;  %v677_v46 = vld [vmem:[#allocation3 + $0x12] sm:$0xff] }
  0x45   : > { %v402_v41 = vld [vmem:[#allocation3 + $0x20] sm:$0xff]  ;;  %1195 = vmatmul.mubr.msk.f32.vlgmr.msra.gmra.mrb[0].mxu1 %vm375_vm1, %v410_v39  ;;  %1221 = vmatpush3.msra.mxu0 %v684_v21  ;;  %v403_v42 = vld [vmem:[#allocation3 + $0x30] sm:$0xff]  ;;  %v830_v21 = vstv (!%p1157_p13), %s1156_s24  ;;  %v1158_v23 = vld [vmem:[%s1711_s3] ss:$0 sm:$0xff] (!%p1157_p13) }
  0x46   : > { %1235 = vmatpush3.msra.mxu1 %v408_v18  ;;  %1197 = vmatprep.mubr.msk.f32.mxu1 %vm375_vm1, %v411_v40  ;;  %v412_v43 = vld [vmem:[#allocation3 + $0x31] sm:$0xff]  ;;  %v676_v44 = vld [vmem:[#allocation3 + $0x2] sm:$0xff]  ;;  %v831_v24 = vadd.s32 (!%p1157_p13), %v830_v21, %v829_v22 }
  0x47   : > { %1211 = vmatprep.mubr.msk.f32.mxu0 %vm375_vm1, %v402_v41  ;;  %v413_v45 = vld [vmem:[#allocation3 + $0x41] sm:$0xff]  ;;  %v414_v47 = vld [vmem:[#allocation3 + $0x51] sm:$0xff] }
  0x48   : > { %1212 = vmatmul.mubr.msk.f32.gmra.mrb[2].mxu0 %vm375_vm1, %v403_v42  ;;  %v678_v48 = vld [vmem:[#allocation3 + $0x22] sm:$0xff]  ;;  %v679_v50 = vld [vmem:[#allocation3 + $0x32] sm:$0xff]  ;;  %vm1598_vm2 = vcmp.le.s32.totalorder (!%p1157_p13), %v831_v24, %v1158_v23 }
  0x49   : > { %1198 = vmatmul.mubr.msk.f32.gmra.mrb[2].mxu1 %vm375_vm1, %v412_v43  ;;  %1222 = vmatprep.mubr.msk.f32.mxu0 %vm375_vm1, %v676_v44  ;;  %v415_v49 = vld [vmem:[#allocation3 + $0x61] sm:$0xff]  ;;  %v416_v51 = vld [vmem:[#allocation3 + $0x71] sm:$0xff] }
  0x4a   : > { %1200 = vmatprep.mubr.msk.f32.mxu1 %vm375_vm1, %v413_v45  ;;  %v680_v52 = vld [vmem:[#allocation3 + $0x42] sm:$0xff]  ;;  %v681_v54 = vld [vmem:[#allocation3 + $0x52] sm:$0xff] }
  0x4b   : > { %v404_v53 = vld [vmem:[#allocation3 + $0x40] sm:$0xff]  ;;  %v405_v55 = vld [vmem:[#allocation3 + $0x50] sm:$0xff] }
  0x4c   : > { %1223 = vmatmul.mubr.msk.f32.vlgmr.msra.gmra.mrb[0].mxu0 %vm375_vm1, %v677_v46  ;;  %v682_v56 = vld [vmem:[#allocation3 + $0x62] sm:$0xff]  ;;  %v683_v58 = vld [vmem:[#allocation3 + $0x72] sm:$0xff] }
  0x4d   : > { %1201 = vmatmul.mubr.msk.f32.gmra.mrb[4].mxu1 %vm375_vm1, %v414_v47  ;;  %1225 = vmatprep.mubr.msk.f32.mxu0 %vm375_vm1, %v678_v48  ;;  %v406_v57 = vld [vmem:[#allocation3 + $0x60] sm:$0xff]  ;;  %v407_v59 = vld [vmem:[#allocation3 + $0x70] sm:$0xff] }
  0x4e   : > { %1203 = vmatprep.mubr.msk.f32.mxu1 %vm375_vm1, %v415_v49 }
  0x50   : > { %1226 = vmatmul.mubr.msk.f32.gmra.mrb[2].mxu0 %vm375_vm1, %v679_v50 }
  0x51   : > { %1204 = vmatmul.mubr.msk.f32.gmra.mrb[6].mxu1 %vm375_vm1, %v416_v51  ;;  %1228 = vmatprep.mubr.msk.f32.mxu0 %vm375_vm1, %v680_v52 }
  0x52   : > { %1214 = vmatprep.mubr.msk.f32.mxu1 %vm375_vm1, %v404_v53 }
  0x54   : > { %1229 = vmatmul.mubr.msk.f32.gmra.mrb[4].mxu0 %vm375_vm1, %v681_v54 }
  0x55   : > { %1215 = vmatmul.mubr.msk.f32.vlgmr.msra.gmra.mrb[4].mxu1 %vm375_vm1, %v405_v55  ;;  %1231 = vmatprep.mubr.msk.f32.mxu0 %vm375_vm1, %v682_v56 }
  0x56   : > { %1217 = vmatprep.mubr.msk.f32.mxu1 %vm375_vm1, %v406_v57 }
  0x58   : > { %1232 = vmatmul.mubr.msk.f32.gmra.mrb[6].mxu0 %vm375_vm1, %v683_v58 }
  0x59   : > { %1218 = vmatmul.mubr.msk.f32.gmra.mrb[6].mxu1 %vm375_vm1, %v407_v59 }
 0x118   : > { %v1196_v60 = vpop.f32.mrb[0].mxu1 }
 0x119   : > { %v508_v61 = vpop.f32.mrb[1].mxu1 }
 0x11c   : > { %v1199_v62 = vpop.f32.mrb[2].mxu1 }
 0x11d   : > { %v518_v63 = vpop.f32.mrb[3].mxu1 }
 0x11f   : > { %v1224_v0 = vpop.f32.mrb[0].mxu0 }
 0x120   : > { %v1578_v1 = vadd.f32 %v1224_v0, %v1196_v60  ;;  %v775_v2 = vpop.f32.mrb[1].mxu0 }
 0x121   : > { %v1580_v3 = vadd.f32 %v775_v2, %v508_v61 }
 0x122   : > { %v841_v27 = vsel (!%p1157_p13), %vm1598_vm2, %v1578_v1, -1e+30 }
 0x123   : > { %v1227_v4 = vpop.f32.mrb[2].mxu0  ;;  %v840_v26 = vsel (!%p1157_p13), %vm1598_vm2, %v1580_v3, -1e+30  ;;  %v857_v35 = vsel (!%p1157_p13), %vm849_vm3, %v841_v27, -inf }
 0x124   : > { %v1582_v5 = vadd.f32 %v1227_v4, %v1199_v62  ;;  %v785_v6 = vpop.f32.mrb[3].mxu0  ;;  %v850_v34 = vsel (!%p1157_p13), %vm849_vm3, %v840_v26, -inf  ;;  %v858_v37 = vrot.slane (!%p1157_p13), %v857_v35, 4 }
 0x125   : > { %v1584_v7 = vadd.f32 %v785_v6, %v518_v63  ;;  %v851_v36 = vrot.slane (!%p1157_p13), %v850_v34, 4 }
 0x126   : > { %v843_v29 = vsel (!%p1157_p13), %vm1598_vm2, %v1582_v5, -1e+30  ;;  %v859_v45 = vmax.f32 (!%p1157_p13), %v857_v35, %v858_v37 }
 0x127   : > { %v1230_v8 = vpop.f32.mrb[4].mxu0  ;;  %v842_v28 = vsel (!%p1157_p13), %vm1598_vm2, %v1584_v7, -1e+30  ;;  %v871_v39 = vsel (!%p1157_p13), %vm849_vm3, %v843_v29, -inf  ;;  %v852_v44 = vmax.f32 (!%p1157_p13), %v850_v34, %v851_v36 }
 0x128   : > { %v1216_v9 = vpop.f32.mrb[4].mxu1  ;;  %v795_v10 = vpop.f32.mrb[5].mxu0  ;;  %827 = sbr.rel (%p1157_p13) target bundleno = 323 (0x143), region = 120  ;;  %v864_v38 = vsel (!%p1157_p13), %vm849_vm3, %v842_v28, -inf  ;;  %v872_v41 = vrot.slane (!%p1157_p13), %v871_v39, 4  ;;  %v860_v53 = vrot.slane (!%p1157_p13), %v859_v45, 2 }
 0x129   : > { %v1586_v11 = vadd.f32 %v1230_v8, %v1216_v9  ;;  %v657_v12 = vpop.f32.mrb[5].mxu1  ;;  %v865_v40 = vrot.slane (!%p1157_p13), %v864_v38, 4  ;;  %v853_v52 = vrot.slane (!%p1157_p13), %v852_v44, 2 }
 0x12a   : > { %v1588_v13 = vadd.f32 %v795_v10, %v657_v12  ;;  %v873_v49 = vmax.f32 (!%p1157_p13), %v871_v39, %v872_v41  ;;  %v861_v61 = vmax.f32 (!%p1157_p13), %v859_v45, %v860_v53 }
 0x12b   : > { %v1233_v14 = vpop.f32.mrb[6].mxu0  ;;  %v845_v31 = vsel (!%p1157_p13), %vm1598_vm2, %v1586_v11, -1e+30  ;;  %v866_v48 = vmax.f32 (!%p1157_p13), %v864_v38, %v865_v40  ;;  %v854_v60 = vmax.f32 (!%p1157_p13), %v852_v44, %v853_v52  ;;  %v848_v38 = vld [vmem:[#allocation2] sm:$0xff] (!%p1157_p13) }
 0x12c   : > { %v1219_v15 = vpop.f32.mrb[6].mxu1  ;;  %v805_v16 = vpop.f32.mrb[7].mxu0  ;;  %v844_v30 = vsel (!%p1157_p13), %vm1598_vm2, %v1588_v13, -1e+30  ;;  %v885_v43 = vsel (!%p1157_p13), %vm849_vm3, %v845_v31, -inf  ;;  %v874_v57 = vrot.slane (!%p1157_p13), %v873_v49, 2 }
 0x12d   : > { %v1590_v17 = vadd.f32 %v1233_v14, %v1219_v15  ;;  %v667_v18 = vpop.f32.mrb[7].mxu1  ;;  %v878_v42 = vsel (!%p1157_p13), %vm849_vm3, %v844_v30, -inf  ;;  %v886_v47 = vrot.slane (!%p1157_p13), %v885_v43, 4  ;;  %v867_v56 = vrot.slane (!%p1157_p13), %v866_v48, 2 }
 0x12e   : > { %v1592_v19 = vadd.f32 %v805_v16, %v667_v18  ;;  %v879_v46 = vrot.slane (!%p1157_p13), %v878_v42, 4  ;;  %v875_v2 = vmax.f32 (!%p1157_p13), %v873_v49, %v874_v57  ;;  %v855_v8 = vrot.slane (!%p1157_p13), %v854_v60, 1 }
 0x12f   : > { %v847_v33 = vsel %vm1598_vm2, %v1590_v17, -1e+30  ;;  %v887_v55 = vmax.f32 %v885_v43, %v886_v47  ;;  %v868_v0 = vmax.f32 %v866_v48, %v867_v56  ;;  %v862_v9 = vrot.slane %v861_v61, 1 }
 0x130   : > { %v846_v32 = vsel %vm1598_vm2, %v1592_v19, -1e+30  ;;  %v899_v51 = vsel %vm849_vm3, %v847_v33, -inf  ;;  %v880_v54 = vmax.f32 %v878_v42, %v879_v46  ;;  %v876_v15 = vrot.slane %v875_v2, 1 }
 0x131   : > { %v892_v50 = vsel %vm849_vm3, %v846_v32, -inf  ;;  %v900_v59 = vrot.slane %v899_v51, 4  ;;  %v888_v63 = vrot.slane %v887_v55, 2  ;;  %v869_v14 = vrot.slane %v868_v0, 1 }
 0x132   : > { %v893_v58 = vrot.slane %v892_v50, 4  ;;  %v881_v62 = vrot.slane %v880_v54, 2  ;;  %v856_v20 = vmax.f32 %v854_v60, %v855_v8  ;;  %v863_v21 = vmax.f32 %v861_v61, %v862_v9 }
 0x133   : > { %v901_v6 = vmax.f32 %v899_v51, %v900_v59  ;;  %v889_v12 = vmax.f32 %v887_v55, %v888_v63  ;;  %v870_v24 = vmax.f32 %v868_v0, %v869_v14  ;;  %v877_v25 = vmax.f32 %v875_v2, %v876_v15 }
 0x134   : > { %v894_v4 = vmax.f32 %v892_v50, %v893_v58  ;;  %v882_v10 = vmax.f32 %v880_v54, %v881_v62  ;;  %v915_v30 = vsel %vm914_vm4, %v863_v21, %v856_v20 }
 0x135   : > { %v902_v18 = vrot.slane %v901_v6, 2  ;;  %v890_v23 = vrot.slane %v889_v12, 1  ;;  %v917_v33 = vsel %vm916_vm5, %v870_v24, %v915_v30 }
 0x136   : > { %v895_v16 = vrot.slane %v894_v4, 2  ;;  %v883_v22 = vrot.slane %v882_v10, 1  ;;  %v919_v34 = vsel %vm918_vm6, %v877_v25, %v917_v33 }
 0x137   : > { %v903_v27 = vmax.f32 %v901_v6, %v902_v18  ;;  %v891_v29 = vmax.f32 %v889_v12, %v890_v23 }
 0x138   : > { %v896_v26 = vmax.f32 %v894_v4, %v895_v16  ;;  %v884_v28 = vmax.f32 %v882_v10, %v883_v22 }
 0x139   : > { %v904_v32 = vrot.slane %v903_v27, 1 }
 0x13a   : > { %v897_v31 = vrot.slane %v896_v26, 1  ;;  %v921_v37 = vsel %vm920_vm7, %v884_v28, %v919_v34 }
 0x13b   : > { %v905_v36 = vmax.f32 %v903_v27, %v904_v32  ;;  %v923_v39 = vsel %vm922_vm8, %v891_v29, %v921_v37 }
 0x13c   : > { %v898_v35 = vmax.f32 %v896_v26, %v897_v31 }
 0x13e   : > { %v925_v40 = vsel %vm924_vm9, %v898_v35, %v923_v39 }
 0x13f   : > { %v927_v41 = vsel %vm926_vm10, %v905_v36, %v925_v40 }
 0x140   : > { %v929_v42 = vmax.f32 %v848_v38, %v927_v41 }
 0x142   : > { %930 = vst.msk [vmem:[#allocation2] sm:$0xff] %vm849_vm3, %v929_v42 }
 0x143 PF: > { %p1159_p0 = scmp.gt.s32.totalorder %s1576_s26, 9 }
 0x144   : > { %vm936_vm11 = vcmask (!%p1159_p0), 97280   ;;  %vm1001_vm12 = vcmask (!%p1159_p0), 1041409   ;;  %vm1003_vm13 = vcmask (!%p1159_p0), 1042434   ;;  %vm1005_vm14 = vcmask (!%p1159_p0), 1043459  }
 0x145   : > { %934 = sbr.rel (%p1159_p0) target bundleno = 348 (0x15c), region = 124  ;;  %v937_v43 = vsel (!%p1159_p0), %vm936_vm11, %v1580_v3, -inf  ;;  %v944_v44 = vsel (!%p1159_p0), %vm936_vm11, %v1578_v1, -inf  ;;  %v951_v45 = vsel (!%p1159_p0), %vm936_vm11, %v1584_v7, -inf  ;;  %v958_v46 = vsel (!%p1159_p0), %vm936_vm11, %v1582_v5, -inf }
 0x146   : > { %v938_v47 = vrot.slane (!%p1159_p0), %v937_v43, 4  ;;  %v945_v48 = vrot.slane (!%p1159_p0), %v944_v44, 4  ;;  %v952_v49 = vrot.slane (!%p1159_p0), %v951_v45, 4  ;;  %v959_v50 = vrot.slane (!%p1159_p0), %v958_v46, 4 }
 0x147   : > { %v965_v51 = vsel (!%p1159_p0), %vm936_vm11, %v1588_v13, -inf  ;;  %v972_v52 = vsel (!%p1159_p0), %vm936_vm11, %v1586_v11, -inf  ;;  %v979_v3 = vsel (!%p1159_p0), %vm936_vm11, %v1592_v19, -inf  ;;  %v986_v1 = vsel (!%p1159_p0), %vm936_vm11, %v1590_v17, -inf }
 0x148   : > { %v939_v7 = vmax.f32 (!%p1159_p0), %v937_v43, %v938_v47  ;;  %v946_v53 = vmax.f32 (!%p1159_p0), %v944_v44, %v945_v48  ;;  %v953_v5 = vmax.f32 (!%p1159_p0), %v951_v45, %v952_v49  ;;  %v960_v54 = vmax.f32 (!%p1159_p0), %v958_v46, %v959_v50 }
 0x149   : > { %v966_v55 = vrot.slane (!%p1159_p0), %v965_v51, 4  ;;  %v973_v56 = vrot.slane (!%p1159_p0), %v972_v52, 4  ;;  %v980_v57 = vrot.slane (!%p1159_p0), %v979_v3, 4  ;;  %v987_v58 = vrot.slane (!%p1159_p0), %v986_v1, 4  ;;  %v935_v39 = vld [vmem:[#allocation2] sm:$0xff] (!%p1159_p0) }
 0x14a   : > { %v940_v13 = vrot.slane (!%p1159_p0), %v939_v7, 2  ;;  %v947_v59 = vrot.slane (!%p1159_p0), %v946_v53, 2  ;;  %v954_v60 = vrot.slane (!%p1159_p0), %v953_v5, 2  ;;  %v961_v11 = vrot.slane (!%p1159_p0), %v960_v54, 2 }
 0x14b   : > { %v967_v61 = vmax.f32 (!%p1159_p0), %v965_v51, %v966_v55  ;;  %v974_v62 = vmax.f32 (!%p1159_p0), %v972_v52, %v973_v56  ;;  %v981_v19 = vmax.f32 (!%p1159_p0), %v979_v3, %v980_v57  ;;  %v988_v63 = vmax.f32 (!%p1159_p0), %v986_v1, %v987_v58 }
 0x14c   : > { %v941_v0 = vmax.f32 %v939_v7, %v940_v13  ;;  %v948_v17 = vmax.f32 %v946_v53, %v947_v59  ;;  %v955_v2 = vmax.f32 %v953_v5, %v954_v60  ;;  %v962_v4 = vmax.f32 %v960_v54, %v961_v11 }
 0x14d   : > { %v968_v6 = vrot.slane %v967_v61, 2  ;;  %v975_v8 = vrot.slane %v974_v62, 2  ;;  %v982_v9 = vrot.slane %v981_v19, 2  ;;  %v989_v10 = vrot.slane %v988_v63, 2 }
 0x14e   : > { %v942_v12 = vrot.slane %v941_v0, 1  ;;  %v949_v14 = vrot.slane %v948_v17, 1  ;;  %v956_v15 = vrot.slane %v955_v2, 1  ;;  %v963_v16 = vrot.slane %v962_v4, 1 }
 0x14f   : > { %v969_v18 = vmax.f32 %v967_v61, %v968_v6  ;;  %v976_v20 = vmax.f32 %v974_v62, %v975_v8  ;;  %v983_v21 = vmax.f32 %v981_v19, %v982_v9  ;;  %v990_v22 = vmax.f32 %v988_v63, %v989_v10 }
 0x150   : > { %v943_v23 = vmax.f32 %v941_v0, %v942_v12  ;;  %v950_v24 = vmax.f32 %v948_v17, %v949_v14  ;;  %v957_v25 = vmax.f32 %v955_v2, %v956_v15  ;;  %v964_v26 = vmax.f32 %v962_v4, %v963_v16 }
 0x151   : > { %v970_v27 = vrot.slane %v969_v18, 1  ;;  %v977_v28 = vrot.slane %v976_v20, 1  ;;  %v984_v29 = vrot.slane %v983_v21, 1  ;;  %v991_v30 = vrot.slane %v990_v22, 1 }
 0x152   : > { %v1002_v31 = vsel %vm1001_vm12, %v950_v24, %v943_v23  ;;  %vm1007_vm15 = vcmask 1044484   ;;  %vm1009_vm0 = vcmask 1045509   ;;  %vm1011_vm1 = vcmask 1046534  }
 0x153   : > { %v971_v32 = vmax.f32 %v969_v18, %v970_v27  ;;  %v978_v33 = vmax.f32 %v976_v20, %v977_v28  ;;  %v985_v34 = vmax.f32 %v983_v21, %v984_v29  ;;  %v1004_v35 = vsel %vm1003_vm13, %v957_v25, %v1002_v31 }
 0x154   : > { %v992_v36 = vmax.f32 %v990_v22, %v991_v30  ;;  %v1006_v37 = vsel %vm1005_vm14, %v964_v26, %v1004_v35  ;;  %vm1013_vm2 = vcmask 1047559  }
 0x155   : > { %v1008_v38 = vsel %vm1007_vm15, %v971_v32, %v1006_v37 }
 0x156   : > { %v1010_v40 = vsel %vm1009_vm0, %v978_v33, %v1008_v38 }
 0x157   : > { %v1012_v41 = vsel %vm1011_vm1, %v985_v34, %v1010_v40 }
 0x158   : > { %v1014_v42 = vsel %vm1013_vm2, %v992_v36, %v1012_v41 }
 0x159   : > { %v1016_v43 = vmax.f32 %v935_v39, %v1014_v42 }
 0x15b   : > { %1017 = vst.msk [vmem:[#allocation2] sm:$0xff] %vm936_vm11, %v1016_v43 }
 0x15c PF: > { %p1160_p1 = scmp.ne.s32.totalorder %s1392_s19, 1 }
 0x15d   : > { %vm1023_vm3 = vcmask (!%p1160_p1), 97280  }
 0x15e   : > { %1021 = sbr.rel (%p1160_p1) target bundleno = 357 (0x165), region = 128 }
 0x162   : > { %v1022_v44 = vld [vmem:[#allocation2] sm:$0xff] (!%p1160_p1) }
 0x163   : > { %1024 = vst.msk [vmem:[#allocation6] sm:$0xff] (!%p1160_p1), %vm1023_vm3, %v1022_v44 }
 0x165 PF: > { %p1661_p2 = scmp.eq.s32.totalorder %s1113_s22, 1  ;;  %s1403_s6 = smov [#allocation6]  }
 0x166   : > { %s1034_s7 = sshll.u32 %s1403_s6, 4  ;;  %s1035_s7 = int_to_ptr.vmem [resolvable:$true] %s1034_s7 }
 0x167   : > { %s1316_s8 = scalar_lea.vmem %s1035_s7, 128  ;;  %p1323_p6 = scmp.lt.s32.totalorder %s1035_s7, %s1035_s7 }
 0x168   : > { %p1317_p3 = scmp.ne.s32.totalorder %s1035_s7, %s1316_s8  ;;  %p1324_p7 = scmp.lt.s32.totalorder %s1316_s8, %s1316_s8 }
 0x16a   : > { %p1318_p4 = pnand %p1317_p3, %p1661_p2  ;;  %p1325_p8 = por %p1324_p7, %p1323_p6 }
 0x16c   : > { %p1319_p5 = pneg %p1318_p4 }
 0x16e   : > { %p1326_p9 = pnand %p1325_p8, %p1319_p5 }
 0x170   : > { %1329 = shalt.err (!%p1326_p9)
}
 0x171   : > { %s1330_s22 = scalar_lea.hbm %s1712_s4, 128 }
 0x172   : > { %p1331_p10 = scmp.ne.s32.totalorder %s1712_s4, %s1330_s22  ;;  %p1336_p13 = scmp.lt.u32.totalorder %s1330_s22, %s1712_s4 }
 0x174   : > { %p1332_p11 = pnand %p1331_p10, %p1661_p2 }
 0x176   : > { %p1333_p12 = pneg %p1332_p11 }
 0x178   : > { %p1338_p0 = pnand %p1336_p13, %p1333_p12 }
 0x17a   : > { %1341 = shalt.err (!%p1338_p0)
}
 0x17b   : > { %1253 = dma.vmem_to_hbm [thread:$0]  (%p1661_p2), %s1035_s7, 128, %s1712_s4, [#allocation7]  }
 0x17c   : > { %1371 = dma.done.wait (%p1661_p2), [#allocation7], 128  }
 0x17d   : > { %1373 = vsyncadd (%p1661_p2), [#allocation7], 4294967168 }
 0x17e PF: > { %s15_s21 = sadd.s32 1, %s1400_s21   ;;  %s1717_s15 = smov %s1380_s16 }
 0x17f   : > { %p12_p1 = scmp.ge.s32.totalorder %s15_s21, 4   ;;  %s1718_s16 = smov %s1482_s5 }
 0x180   : > { %s1719_s17 = smov %s1388_s18  ;;  %s1720_s18 = smov %s1479_s30 }
 0x181   : > { %s1721_s19 = smov %s1396_s20  ;;  %s1722_s20 = smov %s1470_s25 }
 0x182   :  { %14 = sbr.rel (!%p12_p1) target bundleno = 4 (0x4), region = 169 }
 0x189   :  { %1047 = vsyncpa [#allocation7], 1 }
 0x18a   :  { %1049 = vsyncpa [#allocation7 + $0x1], 1 }

</bundles_post_ra>
